<compile_context>
chip_gen: v6e
topology: v6e:2x2x1
jax: 0.10.0
libtpu: 0.0.40
codegen_flags: <defaults>
</compile_context>

<pallas_src>
import jax
import jax.numpy as jnp
from jax import lax
from jax.experimental import pallas as pl
from jax.experimental.pallas import tpu as pltpu


def downsample_kernel(p_ref, wf_ref, bf_ref, gamma_ref, beta_ref, o_ref):
    # p:  (K*Cin, M)  patch matrix, M = N*OH*OW on the lane axis (dense 128)
    # wf: (Cout, K*Cin) fused depthwise*pointwise weights
    # bf, gamma, beta: (Cout, 1)
    # Single MXU pass: fused depthwise + pointwise conv.
    pw = jnp.dot(wf_ref[...], p_ref[...],
                 preferred_element_type=jnp.float32)          # (Cout, M)
    pw = pw + bf_ref[...]                                     # (Cout, 1) bcast

    # BatchNorm2d, training-mode batch stats over N*H*W (the lane/M axis),
    # folded into one scale/shift FMA pass over the (Cout, M) slab.
    mean = jnp.mean(pw, axis=1, keepdims=True)                # (Cout, 1)
    var = jnp.mean((pw - mean) ** 2, axis=1, keepdims=True)   # biased variance
    scale = gamma_ref[...] * lax.rsqrt(var + 1e-5)            # (Cout, 1)
    shift = beta_ref[...] - mean * scale
    y = pw * scale + shift

    # LeakyReLU (negative_slope = 0.01, PyTorch default)
    o_ref[...] = jnp.where(y >= 0, y, 0.01 * y)


def downsample_forward(x_nchw, params, *, kernel, stride, padding):
    """x_nchw: (N, Cin, H, W) float32.  Returns (N, Cout, OH, OW)."""
    w_dw, b_dw, w_pw, b_pw, gamma, beta = params
    N, Cin, H, W = x_nchw.shape
    KH = KW = kernel
    Cout = w_pw.shape[0]
    OH = (H + 2 * padding - KH) // stride + 1
    OW = (W + 2 * padding - KW) // stride + 1
    M = N * OH * OW
    K = KH * KW

    # --- glue: pad + im2col straight into the kernel-native (K*Cin, M)
    #     layout (M = n*OH*OW + oh*OW + ow on the lane axis). ---
    x_pad = jnp.pad(x_nchw,
                    ((0, 0), (0, 0), (padding, padding), (padding, padding)))
    cols = []
    for kh in range(KH):
        for kw in range(KW):
            sl = x_pad[:, :,
                       kh:kh + (OH - 1) * stride + 1:stride,
                       kw:kw + (OW - 1) * stride + 1:stride]   # (N, Cin, OH, OW)
            cols.append(sl)
    taps = jnp.stack(cols, axis=0)                             # (K, N, Cin, OH, OW)
    patches = jnp.transpose(taps, (0, 2, 1, 3, 4)).reshape(K * Cin, M)

    # --- fuse depthwise + pointwise weights (exact linear composition) ---
    wdw_kc = jnp.transpose(w_dw.reshape(Cin, K), (1, 0))       # (K, Cin)
    wpw_2d = w_pw.reshape(Cout, Cin)                           # (Cout, Cin)
    w_fused = (wpw_2d[:, None, :] * wdw_kc[None, :, :]).reshape(Cout, K * Cin)
    b_fused = (wpw_2d @ b_dw + b_pw).reshape(Cout, 1)
    gamma_k = gamma.reshape(Cout, 1)
    beta_k = beta.reshape(Cout, 1)

    # Whole problem is tiny -> single grid point, full-array blocks in VMEM.
    out = pl.pallas_call(
        downsample_kernel,
        out_shape=jax.ShapeDtypeStruct((Cout, M), jnp.float32),
        in_specs=[pl.BlockSpec(memory_space=pltpu.VMEM)] * 5,
        out_specs=pl.BlockSpec(memory_space=pltpu.VMEM),
    )(patches, w_fused, b_fused, gamma_k, beta_k)

    # (Cout, M) -> (Cout, N, OH, OW) -> NCHW
    return jnp.transpose(out.reshape(Cout, N, OH, OW), (1, 0, 2, 3))


def reference_forward(x_nchw, params, *, kernel, stride, padding):
    """Pure-JAX reference (lax conv) for validation."""
    w_dw, b_dw, w_pw, b_pw, gamma, beta = params
    Cin = x_nchw.shape[1]
    dw = lax.conv_general_dilated(
        x_nchw, w_dw, window_strides=(stride, stride),
        padding=[(padding, padding), (padding, padding)],
        feature_group_count=Cin,
        dimension_numbers=('NCHW', 'OIHW', 'NCHW'))
    dw = dw + b_dw[None, :, None, None]
    pw = lax.conv_general_dilated(
        dw, w_pw, window_strides=(1, 1), padding=[(0, 0), (0, 0)],
        dimension_numbers=('NCHW', 'OIHW', 'NCHW'))
    pw = pw + b_pw[None, :, None, None]
    mean = jnp.mean(pw, axis=(0, 2, 3), keepdims=True)
    var = jnp.mean((pw - mean) ** 2, axis=(0, 2, 3), keepdims=True)
    y = (pw - mean) * lax.rsqrt(var + 1e-5)
    y = y * gamma[None, :, None, None] + beta[None, :, None, None]
    return jnp.where(y >= 0, y, 0.01 * y)


if __name__ == "__main__":
    # Module config: Downsample(C_in=4, C_out=8, kernel=3, stride=2, padding=1)
    C_in, C_out, kernel, stride, padding = 4, 8, 3, 2, 1
    N, H, W = 2, 16, 16

    key = jax.random.PRNGKey(0)
    kx, k1, k2, k3, k4 = jax.random.split(key, 5)

    x = jax.random.normal(kx, (N, C_in, H, W), dtype=jnp.float32)

    # Deterministic parameter init (shapes match the PyTorch module).
    w_dw = jax.random.normal(k1, (C_in, 1, kernel, kernel), dtype=jnp.float32) * 0.2
    b_dw = jax.random.normal(k2, (C_in,), dtype=jnp.float32) * 0.1
    w_pw = jax.random.normal(k3, (C_out, C_in, 1, 1), dtype=jnp.float32) * 0.2
    b_pw = jax.random.normal(k4, (C_out,), dtype=jnp.float32) * 0.1
    gamma = jnp.ones((C_out,), dtype=jnp.float32)   # BatchNorm2d default init
    beta = jnp.zeros((C_out,), dtype=jnp.float32)

    params = (w_dw, b_dw, w_pw, b_pw, gamma, beta)

    out = downsample_forward(x, params, kernel=kernel, stride=stride, padding=padding)
    out = jax.block_until_ready(out)

    ref = reference_forward(x, params, kernel=kernel, stride=stride, padding=padding)
    ref = jax.block_until_ready(ref)

    assert out.shape == (N, C_out, H // stride, W // stride), out.shape
    assert jnp.max(jnp.abs(out - ref)) < 1e-3, float(jnp.max(jnp.abs(out - ref)))

    print("KERNEL_OK")
</pallas_src>

<mosaic_0001>
module attributes {stable_mosaic.version = 11 : i64} {
  func.func @downsample_kernel(%arg0: memref<36x128xf32, #tpu.memory_space<vmem>>, %arg1: memref<8x36xf32, #tpu.memory_space<vmem>>, %arg2: memref<8x1xf32, #tpu.memory_space<vmem>>, %arg3: memref<8x1xf32, #tpu.memory_space<vmem>>, %arg4: memref<8x1xf32, #tpu.memory_space<vmem>>, %arg5: memref<8x128xf32, #tpu.memory_space<vmem>>) attributes {dimension_semantics = [], scalar_prefetch = 0 : i64, scratch_operands = 0 : i64, tpu.core_type = #tpu.core_type<tc>} {
    %c0 = arith.constant 0 : index
    %c0_0 = arith.constant 0 : index
    %0 = vector.load %arg1[%c0, %c0_0] : memref<8x36xf32, #tpu.memory_space<vmem>>, vector<8x36xf32>
    %c0_1 = arith.constant 0 : index
    %c0_2 = arith.constant 0 : index
    %1 = vector.load %arg0[%c0_1, %c0_2] : memref<36x128xf32, #tpu.memory_space<vmem>>, vector<36x128xf32>
    %cst = arith.constant dense<0.000000e+00> : vector<8x128xf32>
    %2 = tpu.matmul %0, %1, %cst {dimension_numbers = #tpu.dot_dimension_numbers<[1], [0], [0], [1], [0, 0, 1, 1], [], []>} : vector<8x36xf32>, vector<36x128xf32>, vector<8x128xf32> -> vector<8x128xf32>
    %c0_3 = arith.constant 0 : index
    %c0_4 = arith.constant 0 : index
    %3 = vector.load %arg2[%c0_3, %c0_4] : memref<8x1xf32, #tpu.memory_space<vmem>>, vector<8x1xf32>
    %4 = vector.broadcast %3 : vector<8x1xf32> to vector<8x128xf32>
    %5 = arith.addf %2, %4 : vector<8x128xf32>
    %cst_5 = arith.constant dense<0.000000e+00> : vector<8xf32>
    %6 = vector.multi_reduction <add>, %5, %cst_5 [1] : vector<8x128xf32> to vector<8xf32>
    %7 = vector.shape_cast %6 : vector<8xf32> to vector<8x1xf32>
    %cst_6 = arith.constant 1.280000e+02 : f32
    %8 = vector.broadcast %cst_6 : f32 to vector<8x1xf32>
    %9 = arith.divf %7, %8 : vector<8x1xf32>
    %10 = vector.broadcast %9 : vector<8x1xf32> to vector<8x128xf32>
    %11 = arith.subf %5, %10 : vector<8x128xf32>
    %12 = arith.mulf %11, %11 : vector<8x128xf32>
    %cst_7 = arith.constant dense<0.000000e+00> : vector<8xf32>
    %13 = vector.multi_reduction <add>, %12, %cst_7 [1] : vector<8x128xf32> to vector<8xf32>
    %14 = vector.shape_cast %13 : vector<8xf32> to vector<8x1xf32>
    %cst_8 = arith.constant 1.280000e+02 : f32
    %15 = vector.broadcast %cst_8 : f32 to vector<8x1xf32>
    %16 = arith.divf %14, %15 : vector<8x1xf32>
    %c0_9 = arith.constant 0 : index
    %c0_10 = arith.constant 0 : index
    %17 = vector.load %arg3[%c0_9, %c0_10] : memref<8x1xf32, #tpu.memory_space<vmem>>, vector<8x1xf32>
    %cst_11 = arith.constant 9.99999974E-6 : f32
    %18 = vector.broadcast %cst_11 : f32 to vector<8x1xf32>
    %19 = arith.addf %16, %18 : vector<8x1xf32>
    %20 = math.rsqrt %19 : vector<8x1xf32>
    %21 = arith.mulf %17, %20 : vector<8x1xf32>
    %c0_12 = arith.constant 0 : index
    %c0_13 = arith.constant 0 : index
    %22 = vector.load %arg4[%c0_12, %c0_13] : memref<8x1xf32, #tpu.memory_space<vmem>>, vector<8x1xf32>
    %23 = arith.mulf %9, %21 : vector<8x1xf32>
    %24 = arith.subf %22, %23 : vector<8x1xf32>
    %25 = vector.broadcast %21 : vector<8x1xf32> to vector<8x128xf32>
    %26 = arith.mulf %5, %25 : vector<8x128xf32>
    %27 = vector.broadcast %24 : vector<8x1xf32> to vector<8x128xf32>
    %28 = arith.addf %26, %27 : vector<8x128xf32>
    %cst_14 = arith.constant 0.000000e+00 : f32
    %29 = vector.broadcast %cst_14 : f32 to vector<8x128xf32>
    %30 = arith.cmpf oge, %28, %29 : vector<8x128xf32>
    %cst_15 = arith.constant 0.00999999977 : f32
    %31 = vector.broadcast %cst_15 : f32 to vector<8x128xf32>
    %32 = arith.mulf %31, %28 : vector<8x128xf32>
    %33 = arith.select %30, %28, %32 : vector<8x128xi1>, vector<8x128xf32>
    %c0_16 = arith.constant 0 : index
    %c0_17 = arith.constant 0 : index
    %34 = vector.load %arg5[%c0_16, %c0_17] : memref<8x128xf32, #tpu.memory_space<vmem>>, vector<8x128xf32>
    tpu.vector_store %arg5[%c0_16, %c0_17], %33 {strides = array<i32>} : memref<8x128xf32, #tpu.memory_space<vmem>>, vector<8x128xf32>,
    return
  }
}

</mosaic_0001>

<bundles_post_ra>
// kernel: tpu_custom_call.1
= control target key start
LH: loop header
LB: loop body
LE: loop exit
PB: predicated region body
PF: predicated region fallthrough
CT: control target
= control target key end

     0   :  { %10 = vsyncpa [#allocation3], 0  ;;  %s303_s0 = inlined_call_operand.hbm [shape: f32[36,128], index: 0, kind: input, shape index: {}]   ;;  %s304_s1 = inlined_call_operand.vmem [shape: f32[8,36], index: 1, kind: input, shape index: {}]   ;;  %s305_s2 = inlined_call_operand.vmem [shape: f32[8,1], index: 2, kind: input, shape index: {}]   ;;  %s306_s3 = inlined_call_operand.vmem [shape: f32[8,1], index: 3, kind: input, shape index: {}]   ;;  %s307_s4 = inlined_call_operand.vmem [shape: f32[8,1], index: 4, kind: input, shape index: {}]   ;;  %s308_s5 = inlined_call_operand.hbm [shape: f32[8,128], index: 5, kind: output, shape index: {}]  }
   0x1   :  { %11 = vsyncpa [#allocation4], 0  ;;  %s248_s18 = smov [#allocation2]  }
   0x2   :  { %s17_s19 = sshll.u32 %s248_s18, 4  ;;  %s18_s19 = int_to_ptr.vmem [resolvable:$true] %s17_s19 }
   0x3   :  { %s212_s20 = scalar_lea.vmem %s18_s19, 640  ;;  %p217_p1 = scmp.lt.s32.totalorder %s18_s19, %s18_s19 }
   0x4   :  { %p213_p0 = scmp.ne.s32.totalorder %s18_s19, %s212_s20  ;;  %p218_p2 = scmp.lt.s32.totalorder %s212_s20, %s212_s20 }
   0x6   :  { %p219_p3 = por %p218_p2, %p217_p1 }
   0x8   :  { %p220_p4 = pnand %p219_p3, %p213_p0 }
   0xa   :  { %223 = shalt.err (!%p220_p4)
}
   0xb   :  { %s249_s21 = smov 128   ;;  %s250_s22 = smov 8  }
   0xc   :  { %23 = dma.hbm_to_vmem [thread:$0]  %s303_s0, 640, %s18_s19, [#allocation3], %s249_s21, %s249_s21, %s250_s22  }
   0xd   :  { %244 = dma.done.wait [#allocation3], 640  }
   0xe   :  { %245 = vsyncadd [#allocation3], 4294966656  ;;  %v251_v0 = vmov 0.0   ;;  %vm252_vm0 = vmmov 0   ;;  %v253_v1 = vmov 0   ;;  %vm51_vm1 = vcmask 1043456  }
   0xf   :  { %180 = vmatprep.subr.mxu0 %v251_v0  ;;  %190 = vmatprep.mubr.msk.f32.mxu0 %vm252_vm0, %v251_v0  ;;  %v40_v2 = vld [vmem:[#allocation2 + $0x20] sm:$0xf]  ;;  %v39_v3 = vld [vmem:[#allocation2 + $0x18] sm:$0xff]  ;;  %v38_v4 = vld [vmem:[#allocation2 + $0x10] sm:$0xff]  ;;  %vm47_vm2 = vcmask 293888   ;;  %s254_s30 = smov [#allocation5]  }
  0x10   :  { %200 = vset.pattern.permute.xlu0 %v253_v1  ;;  %201 = vset.pattern.permute.xlu1 %v253_v1  ;;  %v41_v5 = vld [vmem:[%s305_s2] sm:$0xff]  ;;  %v37_v6 = vld [vmem:[#allocation2 + $0x8] sm:$0xff]  ;;  %s163_s6 = sshll.u32 %s254_s30, 4  ;;  %s164_s6 = int_to_ptr.vmem [resolvable:$true] %s163_s6 }
  0x11   :  { %181 = vmatpush3.msk.msra.mxu0 %vm51_vm1, %v40_v2  ;;  %44 = vperm.xlu0 %200, %v41_v5   ;;  %v36_v7 = vld [vmem:[#allocation2] sm:$0xff]  ;;  %p229_p6 = scmp.lt.s32.totalorder %s164_s6, %s164_s6 }
  0x12   :  { %182 = vmatprep.subr.mxu0 %v251_v0  ;;  %v35_v8 = vld [vmem:[%s304_s1] sm:$0xff] }
  0x13   :  { %183 = vmatpush3.msra.mxu0 %v39_v3  ;;  %v134_v20 = vld [vmem:[%s306_s3] sm:$0xff]  ;;  %s224_s3 = scalar_lea.vmem %s164_s6, 128 }
  0x14   :  { %184 = vmatprep.subr.mxu0 %v251_v0  ;;  %v138_v23 = vld [vmem:[%s307_s4] sm:$0xff]  ;;  %p225_p5 = scmp.ne.s32.totalorder %s164_s6, %s224_s3  ;;  %p230_p7 = scmp.lt.s32.totalorder %s224_s3, %s224_s3 }
  0x15   :  { %185 = vmatpush3.msra.mxu0 %v38_v4 }
  0x16   :  { %186 = vmatprep.subr.mxu0 %v251_v0  ;;  %p231_p8 = por %p230_p7, %p229_p6 }
  0x17   :  { %187 = vmatpush3.msra.mxu0 %v37_v6 }
  0x18   :  { %188 = vmatprep.subr.mxu0 %v251_v0  ;;  %p232_p9 = pnand %p231_p8, %p225_p5 }
  0x19   :  { %189 = vmatpush3.msra.mxu0 %v36_v7 }
  0x1a   :  { %191 = vmatmul.mubr.msk.f32.vlgmr.msra.gmra.mxu0 %vm47_vm2, %v35_v8 }
  0x8c   :  { %v45_v9 = vpop.permute.xlu0 %44 }
  0xda   :  { %v121_v10 = vpop.f32.mrf.mxu0 }
  0xdb   :  { %v122_v11 = vadd.f32 %v121_v10, %v45_v9 }
  0xdc   :  { %v192_v12 = vpop.f32.mrf.mxu0 }
  0xdd   :  { %125 = vadd.xlane.f32.xlu0 %v122_v11 }
 0x166   :  { %v126_v13 = vpop.xlane.xlu0 %125 }
 0x167   :  { %v128_v14 = vmul.f32 0.0078125, %v126_v13 }
 0x169   :  { %v129_v15 = vsub.f32 %v122_v11, %v128_v14 }
 0x16b   :  { %v130_v16 = vmul.f32 %v129_v15, %v129_v15 }
 0x16d   :  { %131 = vadd.xlane.f32.xlu1 %v130_v16 }
 0x1f6   :  { %v132_v17 = vpop.xlane.xlu1 %131 }
 0x1f7   :  { %v133_v18 = vmul.f32 0.0078125, %v132_v17 }
 0x1f9   :  { %v135_v19 = vadd.f32 1e-05, %v133_v18 }
 0x1fb   :  { %202 = vrsqrt.f32 %v135_v19 }
 0x208   :  { %v203_v21 = vpop.eup %202 }
 0x209   :  { %v137_v22 = vmul.f32 %v203_v21, %v134_v20 }
 0x20b   :  { %143 = vperm.xlu1 %201, %v137_v22   ;;  %v139_v24 = vmul.f32 %v137_v22, %v128_v14 }
 0x20d   :  { %v140_v25 = vsub.f32 %v138_v23, %v139_v24 }
 0x20f   :  { %149 = vperm.xlu1 %201, %v140_v25  }
 0x286   :  { %v144_v26 = vpop.permute.xlu1 %143 }
 0x287   :  { %v146_v27 = vmul.f32 %v144_v26, %v122_v11 }
 0x28a   :  { %v150_v28 = vpop.permute.xlu1 %149 }
 0x28b   :  { %v152_v29 = vadd.f32 %v150_v28, %v146_v27 }
 0x28d   :  { %v154_v30 = vmul.f32 0.01, %v152_v29  ;;  %vm153_vm3 = vcmp.ge.f32.partialorder %v152_v29, 0.0 }
 0x28f   :  { %v155_v31 = vsel %vm153_vm3, %v152_v29, %v154_v30 }
 0x290   :  { %156 = vst [vmem:[#allocation5] sm:$0xff] %v155_v31 }
 0x291   :  { %235 = shalt.err (!%p232_p9)
}
 0x292   :  { %166 = dma.vmem_to_hbm [thread:$0]  %s164_s6, 128, %s308_s5, [#allocation4]  }
 0x293   :  { %246 = dma.done.wait [#allocation4], 128  }
 0x294   :  { %247 = vsyncadd [#allocation4], 4294967168 }
 0x295   :  { %170 = vsyncpa [#allocation3], 1 }
 0x296   :  { %171 = vsyncpa [#allocation4], 1 }

</bundles_post_ra>
